<compile_context>
chip_gen: v5e
topology: v5e:2x2
jax: 0.10.0
libtpu: 0.0.40
codegen_flags: <defaults>
</compile_context>

<pallas_src>
import jax
import jax.numpy as jnp
from jax import lax
from jax.experimental import pallas as pl
from jax.experimental.pallas import tpu as pltpu


_LANE = 128
_SUBLANE = 8


def _padded_vmem_bytes(shape, dtype):
    """VMEM footprint with (8*packing, 128) tiling on the trailing two dims."""
    itemsize = jnp.dtype(dtype).itemsize
    packing = max(1, 4 // itemsize)
    if len(shape) == 0:
        return 4
    if len(shape) == 1:
        rows, cols, lead = 1, int(shape[0]), 1
    else:
        rows, cols = int(shape[-2]), int(shape[-1])
        lead = 1
        for s in shape[:-2]:
            lead *= int(s)
    sub = _SUBLANE * packing
    padded_rows = pl.cdiv(rows, sub) * sub
    padded_cols = pl.cdiv(cols, _LANE) * _LANE
    return lead * padded_rows * padded_cols * itemsize


def _physical_vmem_bytes():
    """Per-generation VMEM budget; falls back to v7x's 64 MiB (smallest)."""
    try:
        return int(pltpu.get_tpu_info().vmem_capacity_bytes)
    except Exception:
        return 64 * 1024 * 1024


def _single_shot_vmem_bytes(B, N, D, F_out, compute_dtype):
    return (
        _padded_vmem_bytes((B * N, D), compute_dtype)            # features
        + _padded_vmem_bytes((B, N, N), compute_dtype)           # A
        + _padded_vmem_bytes((D, 2 * F_out), compute_dtype)      # W12
        + _padded_vmem_bytes((1, F_out), jnp.float32)            # bias
        + _padded_vmem_bytes((B, N, F_out), jnp.float32)         # output
        + _padded_vmem_bytes((B * N, F_out), jnp.float32)        # x1 scratch
        + _padded_vmem_bytes((B * N, F_out), compute_dtype)      # x2 scratch
    )


# ---------------------------------------------------------------------------
# Single-shot path: whole problem resident in VMEM, grid=().
# ---------------------------------------------------------------------------
def _graphconv_single_kernel(feat2d_ref, a_ref, w12_ref, bias_ref, out_ref,
                             x1_sc, x2_sc):
    # feat2d_ref: (B*N, D) compute dtype
    # a_ref     : (B, N, N) compute dtype
    # w12_ref   : (D, 2F)  compute dtype  ([W[:D] | W[D:]] along lanes)
    # bias_ref  : (1, F)   f32
    # out_ref   : (B, N, F) f32
    # x1_sc     : (B*N, F) f32            (feat @ W1)
    # x2_sc     : (B*N, F) compute dtype  (feat @ W2, feeds second MXU pass)
    num_batches, n, _ = a_ref.shape
    f_out = out_ref.shape[-1]

    # ONE MXU push covers every batch's feature x weight product, both halves.
    y = jnp.dot(feat2d_ref[...], w12_ref[...],
                preferred_element_type=jnp.float32)          # (B*N, 2F)
    x1_sc[...] = y[:, :f_out]
    x2_sc[...] = y[:, f_out:].astype(x2_sc.dtype)

    # Hoisted: JAX does not CSE broadcast_in_dim inside (unrolled) loops.
    bias_row = jnp.broadcast_to(bias_ref[...], (n, f_out))

    def body(b, carry):
        row0 = b * n
        if n % _SUBLANE == 0:
            row0 = pl.multiple_of(row0, n)
        x1_b = x1_sc[pl.ds(row0, n), :]
        x2_b = x2_sc[pl.ds(row0, n), :]
        # A @ (feat @ W2) == (A @ feat) @ W2 ; only this dot depends on b.
        out = x1_b + jnp.dot(a_ref[b], x2_b, preferred_element_type=jnp.float32)
        out_ref[b] = jnp.maximum(out + bias_row, 0.0).astype(out_ref.dtype)
        return carry

    # Full unroll only while small enough not to blow vreg live ranges.
    lax.fori_loop(0, num_batches, body, 0, unroll=(num_batches <= 8))


def _graph_conv_single(features, A, weight, bias, compute_dtype, vmem_budget):
    B, N, D = features.shape
    F_out = weight.shape[1]

    feat2d = features.reshape(B * N, D).astype(compute_dtype)
    a_c = A.astype(compute_dtype)
    # Fuse the concat-weight halves along the OUTPUT axis: one contiguous tile,
    # one MXU push, no in-kernel sublane slicing of W.
    w12 = jnp.concatenate([weight[:D, :], weight[D:, :]], axis=1).astype(compute_dtype)
    bias2d = bias.reshape(1, F_out).astype(jnp.float32)

    needed = _single_shot_vmem_bytes(B, N, D, F_out, compute_dtype)
    vmem_limit = int(min(max(2 * needed, 32 * 1024 * 1024),
                         int(0.9 * vmem_budget)))

    vmem = pltpu.MemorySpace.VMEM
    return pl.pallas_call(
        _graphconv_single_kernel,
        out_shape=jax.ShapeDtypeStruct((B, N, F_out), jnp.float32),
        in_specs=[
            pl.BlockSpec(memory_space=vmem),   # features (B*N, D)
            pl.BlockSpec(memory_space=vmem),   # A        (B, N, N)
            pl.BlockSpec(memory_space=vmem),   # W12      (D, 2F)
            pl.BlockSpec(memory_space=vmem),   # bias     (1, F)
        ],
        out_specs=pl.BlockSpec(memory_space=vmem),
        scratch_shapes=[
            pltpu.VMEM((B * N, F_out), jnp.float32),
            pltpu.VMEM((B * N, F_out), compute_dtype),
        ],
        compiler_params=pltpu.CompilerParams(vmem_limit_bytes=vmem_limit),
    )(feat2d, a_c, w12, bias2d)


# ---------------------------------------------------------------------------
# Row-tiled path: grid=(B, N//TM), double-buffered A tiles, both axes parallel.
# ---------------------------------------------------------------------------
def _graphconv_tiled_kernel(feat_ref, a_ref, w_ref, bias_ref, out_ref):
    # feat_ref: (N, D)  batch-b features, resident across the row-tile axis
    # a_ref   : (TM, N) one adjacency row tile of batch b
    # w_ref   : (2D, F) full concat weight, resident
    # bias_ref: (1, F)  f32
    # out_ref : (TM, F) f32
    tm = out_ref.shape[0]
    row0 = pl.multiple_of(pl.program_id(1) * tm, tm)
    feat_tile = feat_ref[pl.ds(row0, tm), :]                        # (TM, D)
    agg = jnp.dot(a_ref[...], feat_ref[...],
                  preferred_element_type=jnp.float32)               # (TM, D)
    cat = jnp.concatenate([feat_tile, agg.astype(feat_ref.dtype)], axis=-1)
    out = jnp.dot(cat, w_ref[...], preferred_element_type=jnp.float32)
    out_ref[...] = jnp.maximum(out + bias_ref[...], 0.0).astype(out_ref.dtype)


def _graph_conv_tiled(features, A, weight, bias, compute_dtype, vmem_budget, tm):
    B, N, D = features.shape
    F_out = weight.shape[1]

    feat_c = features.astype(compute_dtype)
    a_c = A.astype(compute_dtype)
    w_c = weight.astype(compute_dtype)
    bias2d = bias.reshape(1, F_out).astype(jnp.float32)

    def tile_bytes(t):
        # 2x: BlockSpec double-buffers pipelined blocks (and per-batch re-fetch).
        return (2 * _padded_vmem_bytes((t, N), compute_dtype)          # A tile
                + 2 * _padded_vmem_bytes((t, F_out), jnp.float32)      # out tile
                + 2 * _padded_vmem_bytes((N, D), compute_dtype)        # features
                + 2 * _padded_vmem_bytes((2 * D, F_out), compute_dtype)
                + 2 * _padded_vmem_bytes((1, F_out), jnp.float32))

    if tm is None:
        for cand in (1024, 512, 256, 128, 64, 32, 16, 8):
            if N % cand == 0 and tile_bytes(cand) <= 0.7 * vmem_budget:
                tm = cand
                break
    assert tm is not None and N % tm == 0 and tm % _SUBLANE == 0, (
        "tiled path needs a row-tile size that divides N and is a multiple of 8")

    vmem_limit = int(min(max(2 * tile_bytes(tm), 32 * 1024 * 1024),
                         int(0.9 * vmem_budget)))

    return pl.pallas_call(
        _graphconv_tiled_kernel,
        out_shape=jax.ShapeDtypeStruct((B, N, F_out), jnp.float32),
        grid=(B, N // tm),
        in_specs=[
            pl.BlockSpec((None, N, D), lambda b, i: (b, 0, 0)),    # features
            pl.BlockSpec((None, tm, N), lambda b, i: (b, i, 0)),   # A row tile
            pl.BlockSpec((2 * D, F_out), lambda b, i: (0, 0)),     # weight
            pl.BlockSpec((1, F_out), lambda b, i: (0, 0)),         # bias
        ],
        out_specs=pl.BlockSpec((None, tm, F_out), lambda b, i: (b, i, 0)),
        compiler_params=pltpu.CompilerParams(
            # Every (b, row-tile) block is independent -> both axes parallel;
            # lets v7x's second TensorCore take half the grid (harmless on 1-TC).
            dimension_semantics=("parallel", "parallel"),
            vmem_limit_bytes=vmem_limit,
        ),
    )(feat_c, a_c, w_c, bias2d)


# ---------------------------------------------------------------------------
# Public wrapper.
# ---------------------------------------------------------------------------
def graph_conv(features, A, weight, bias, *, compute_dtype=jnp.bfloat16,
               mode="auto", tm=None):
    """GraphConv forward: relu(concat([feat, A @ feat], -1) @ W + bias).

    compute_dtype: dtype fed to the MXU (all dots accumulate in f32).
      Default bfloat16 halves A's HBM traffic (the kernel is A-bandwidth-bound
      at small D) and uses the MXU's native rate.  Use jnp.float32 for
      bit-faithful f32 semantics.
    """
    B, N, D = features.shape
    two_d, F_out = weight.shape
    assert two_d == 2 * D
    assert A.shape == (B, N, N)
    assert bias.shape == (F_out,)

    vmem_budget = _physical_vmem_bytes()

    if mode == "auto":
        single_bytes = _single_shot_vmem_bytes(B, N, D, F_out, compute_dtype)
        mode = "single" if single_bytes <= 0.4 * vmem_budget else "tiled"

    if mode == "single":
        return _graph_conv_single(features, A, weight, bias, compute_dtype,
                                  vmem_budget)
    elif mode == "tiled":
        return _graph_conv_tiled(features, A, weight, bias, compute_dtype,
                                 vmem_budget, tm)
    else:
        raise ValueError(f"unknown mode: {mode}")


def graph_conv_ref(features, A, weight, bias):
    agg = jnp.einsum('bij,bjd->bid', A, features)
    cat = jnp.concatenate([features, agg], axis=2)
    out = jnp.einsum('bnd,df->bnf', cat, weight)
    return jax.nn.relu(out + bias)


if __name__ == "__main__":
    B, N, D, F_out = 2, 16, 32, 32

    key = jax.random.PRNGKey(0)
    k_feat, k_adj, k_w = jax.random.split(key, 3)

    features = jax.random.normal(k_feat, (B, N, D), dtype=jnp.float32)

    # Row-normalized adjacency (what a MeanAggregator expects).
    adj_raw = jax.random.uniform(k_adj, (B, N, N), dtype=jnp.float32)
    A = adj_raw / jnp.sum(adj_raw, axis=-1, keepdims=True)

    # Deterministic xavier_uniform_-style weight, bias = 0.
    bound = (6.0 / (2 * D + F_out)) ** 0.5
    weight = jax.random.uniform(k_w, (2 * D, F_out), dtype=jnp.float32,
                                minval=-bound, maxval=bound)
    bias = jnp.zeros((F_out,), dtype=jnp.float32)

    ref = graph_conv_ref(features, A, weight, bias)

    # 1) Bit-faithful f32 compute path (exact module semantics), single-shot.
    out_f32 = graph_conv(features, A, weight, bias,
                         compute_dtype=jnp.float32, mode="single")
    jax.block_until_ready(out_f32)
    assert out_f32.shape == (B, N, F_out)
    assert jnp.allclose(out_f32, ref, atol=1e-4, rtol=1e-4), "f32 path mismatch"

    # 2) Default bandwidth-optimal bf16-fed path (f32 accumulation).
    out_bf16 = graph_conv(features, A, weight, bias)
    jax.block_until_ready(out_bf16)
    ref_bf16 = graph_conv_ref(
        features.astype(jnp.bfloat16).astype(jnp.float32),
        A.astype(jnp.bfloat16).astype(jnp.float32),
        weight.astype(jnp.bfloat16).astype(jnp.float32),
        bias)
    assert jnp.allclose(out_bf16, ref_bf16, atol=2e-2, rtol=2e-2), \
        "bf16 path mismatch vs bf16-rounded reference"
    assert jnp.allclose(out_bf16, ref, atol=5e-2, rtol=5e-2), \
        "bf16 path too far from f32 reference"

    # 3) Row-tiled pipelined path at a modestly larger N (exercises the grid,
    #    squeezed batch dim and dimension_semantics).
    N2 = 256
    k_feat2, k_adj2 = jax.random.split(jax.random.PRNGKey(1), 2)
    features2 = jax.random.normal(k_feat2, (B, N2, D), dtype=jnp.float32)
    adj2 = jax.random.uniform(k_adj2, (B, N2, N2), dtype=jnp.float32)
    A2 = adj2 / jnp.sum(adj2, axis=-1, keepdims=True)
    ref2 = graph_conv_ref(features2, A2, weight, bias)
    out2 = graph_conv(features2, A2, weight, bias,
                      compute_dtype=jnp.float32, mode="tiled", tm=64)
    jax.block_until_ready(out2)
    assert jnp.allclose(out2, ref2, atol=1e-4, rtol=1e-4), "tiled path mismatch"

    print("KERNEL_OK")
</pallas_src>

<mosaic_0001>
module attributes {stable_mosaic.version = 11 : i64} {
  func.func @_graphconv_single_kernel(%arg0: memref<32x32xf32, #tpu.memory_space<vmem>>, %arg1: memref<2x16x16xf32, #tpu.memory_space<vmem>>, %arg2: memref<32x64xf32, #tpu.memory_space<vmem>>, %arg3: memref<1x32xf32, #tpu.memory_space<vmem>>, %arg4: memref<2x16x32xf32, #tpu.memory_space<vmem>>, %arg5: memref<32x32xf32, #tpu.memory_space<vmem>>, %arg6: memref<32x32xf32, #tpu.memory_space<vmem>>) attributes {dimension_semantics = [], scalar_prefetch = 0 : i64, scratch_operands = 2 : i64, tpu.core_type = #tpu.core_type<tc>} {
    %c0 = arith.constant 0 : index
    %c0_0 = arith.constant 0 : index
    %0 = vector.load %arg0[%c0, %c0_0] : memref<32x32xf32, #tpu.memory_space<vmem>>, vector<32x32xf32>
    %c0_1 = arith.constant 0 : index
    %c0_2 = arith.constant 0 : index
    %1 = vector.load %arg2[%c0_1, %c0_2] : memref<32x64xf32, #tpu.memory_space<vmem>>, vector<32x64xf32>
    %cst = arith.constant dense<0.000000e+00> : vector<32x64xf32>
    %2 = tpu.matmul %0, %1, %cst {dimension_numbers = #tpu.dot_dimension_numbers<[1], [0], [0], [1], [0, 0, 1, 1], [], []>} : vector<32x32xf32>, vector<32x64xf32>, vector<32x64xf32> -> vector<32x64xf32>
    %3 = vector.extract_strided_slice %2 {offsets = [0, 0], sizes = [32, 32], strides = [1, 1]} : vector<32x64xf32> to vector<32x32xf32>
    %c0_3 = arith.constant 0 : index
    %c0_4 = arith.constant 0 : index
    %4 = vector.load %arg5[%c0_3, %c0_4] : memref<32x32xf32, #tpu.memory_space<vmem>>, vector<32x32xf32>
    tpu.vector_store %arg5[%c0_3, %c0_4], %3 {strides = array<i32>} : memref<32x32xf32, #tpu.memory_space<vmem>>, vector<32x32xf32>,
    %5 = vector.extract_strided_slice %2 {offsets = [0, 32], sizes = [32, 32], strides = [1, 1]} : vector<32x64xf32> to vector<32x32xf32>
    %c0_5 = arith.constant 0 : index
    %c0_6 = arith.constant 0 : index
    %6 = vector.load %arg6[%c0_5, %c0_6] : memref<32x32xf32, #tpu.memory_space<vmem>>, vector<32x32xf32>
    tpu.vector_store %arg6[%c0_5, %c0_6], %5 {strides = array<i32>} : memref<32x32xf32, #tpu.memory_space<vmem>>, vector<32x32xf32>,
    %c0_7 = arith.constant 0 : index
    %c0_8 = arith.constant 0 : index
    %7 = vector.load %arg3[%c0_7, %c0_8] : memref<1x32xf32, #tpu.memory_space<vmem>>, vector<1x32xf32>
    %8 = vector.shape_cast %7 : vector<1x32xf32> to vector<1x32xf32>
    %9 = vector.broadcast %8 : vector<1x32xf32> to vector<16x32xf32>
    %c0_i32 = arith.constant 0 : i32
    %c16_i32 = arith.constant 16 : i32
    %10 = arith.muli %c0_i32, %c16_i32 : i32
    %11 = tpu.assume_multiple %10, 16 : i32
    %12 = arith.index_cast %11 : i32 to index
    %c0_9 = arith.constant 0 : index
    %13 = vector.load %arg5[%12, %c0_9] : memref<32x32xf32, #tpu.memory_space<vmem>>, vector<16x32xf32>
    %14 = arith.index_cast %11 : i32 to index
    %c0_10 = arith.constant 0 : index
    %15 = vector.load %arg6[%14, %c0_10] : memref<32x32xf32, #tpu.memory_space<vmem>>, vector<16x32xf32>
    %16 = arith.index_cast %c0_i32 : i32 to index
    %c0_11 = arith.constant 0 : index
    %c0_12 = arith.constant 0 : index
    %17 = vector.load %arg1[%16, %c0_11, %c0_12] : memref<2x16x16xf32, #tpu.memory_space<vmem>>, vector<1x16x16xf32>
    %18 = vector.shape_cast %17 : vector<1x16x16xf32> to vector<16x16xf32>
    %cst_13 = arith.constant dense<0.000000e+00> : vector<16x32xf32>
    %19 = tpu.matmul %18, %15, %cst_13 {dimension_numbers = #tpu.dot_dimension_numbers<[1], [0], [0], [1], [0, 0, 1, 1], [], []>} : vector<16x16xf32>, vector<16x32xf32>, vector<16x32xf32> -> vector<16x32xf32>
    %20 = arith.addf %13, %19 : vector<16x32xf32>
    %21 = arith.addf %20, %9 : vector<16x32xf32>
    %cst_14 = arith.constant 0.000000e+00 : f32
    %22 = vector.broadcast %cst_14 : f32 to vector<16x32xf32>
    %23 = arith.maximumf %21, %22 : vector<16x32xf32>
    %24 = arith.index_cast %c0_i32 : i32 to index
    %c0_15 = arith.constant 0 : index
    %c0_16 = arith.constant 0 : index
    %25 = vector.load %arg4[%24, %c0_15, %c0_16] : memref<2x16x32xf32, #tpu.memory_space<vmem>>, vector<1x16x32xf32>
    %26 = vector.shape_cast %25 : vector<1x16x32xf32> to vector<16x32xf32>
    %27 = vector.shape_cast %23 : vector<16x32xf32> to vector<1x16x32xf32>
    tpu.vector_store %arg4[%24, %c0_15, %c0_16], %27 {strides = array<i32>} : memref<2x16x32xf32, #tpu.memory_space<vmem>>, vector<1x16x32xf32>,
    %c1_i32 = arith.constant 1 : i32
    %c16_i32_17 = arith.constant 16 : i32
    %28 = arith.muli %c1_i32, %c16_i32_17 : i32
    %29 = tpu.assume_multiple %28, 16 : i32
    %30 = arith.index_cast %29 : i32 to index
    %c0_18 = arith.constant 0 : index
    %31 = vector.load %arg5[%30, %c0_18] : memref<32x32xf32, #tpu.memory_space<vmem>>, vector<16x32xf32>
    %32 = arith.index_cast %29 : i32 to index
    %c0_19 = arith.constant 0 : index
    %33 = vector.load %arg6[%32, %c0_19] : memref<32x32xf32, #tpu.memory_space<vmem>>, vector<16x32xf32>
    %34 = arith.index_cast %c1_i32 : i32 to index
    %c0_20 = arith.constant 0 : index
    %c0_21 = arith.constant 0 : index
    %35 = vector.load %arg1[%34, %c0_20, %c0_21] : memref<2x16x16xf32, #tpu.memory_space<vmem>>, vector<1x16x16xf32>
    %36 = vector.shape_cast %35 : vector<1x16x16xf32> to vector<16x16xf32>
    %cst_22 = arith.constant dense<0.000000e+00> : vector<16x32xf32>
    %37 = tpu.matmul %36, %33, %cst_22 {dimension_numbers = #tpu.dot_dimension_numbers<[1], [0], [0], [1], [0, 0, 1, 1], [], []>} : vector<16x16xf32>, vector<16x32xf32>, vector<16x32xf32> -> vector<16x32xf32>
    %38 = arith.addf %31, %37 : vector<16x32xf32>
    %39 = arith.addf %38, %9 : vector<16x32xf32>
    %cst_23 = arith.constant 0.000000e+00 : f32
    %40 = vector.broadcast %cst_23 : f32 to vector<16x32xf32>
    %41 = arith.maximumf %39, %40 : vector<16x32xf32>
    %42 = arith.index_cast %c1_i32 : i32 to index
    %c0_24 = arith.constant 0 : index
    %c0_25 = arith.constant 0 : index
    %43 = vector.load %arg4[%42, %c0_24, %c0_25] : memref<2x16x32xf32, #tpu.memory_space<vmem>>, vector<1x16x32xf32>
    %44 = vector.shape_cast %43 : vector<1x16x32xf32> to vector<16x32xf32>
    %45 = vector.shape_cast %41 : vector<16x32xf32> to vector<1x16x32xf32>
    tpu.vector_store %arg4[%42, %c0_24, %c0_25], %45 {strides = array<i32>} : memref<2x16x32xf32, #tpu.memory_space<vmem>>, vector<1x16x32xf32>,
    %c2_i32 = arith.constant 2 : i32
    return
  }
}

</mosaic_0001>

<bundles_post_ra>
// kernel: tpu_custom_call.1
= control target key start
LH: loop header
LB: loop body
LE: loop exit
PB: predicated region body
PF: predicated region fallthrough
CT: control target
= control target key end

     0   :  { %9 = vsyncpa [#allocation5], 0  ;;  %s451_s0 = inlined_call_operand.hbm [shape: f32[32,32], index: 0, kind: input, shape index: {}]   ;;  %s452_s1 = inlined_call_operand.hbm [shape: f32[2,16,16], index: 1, kind: input, shape index: {}]   ;;  %s453_s2 = inlined_call_operand.hbm [shape: f32[32,64], index: 2, kind: input, shape index: {}]   ;;  %s454_s3 = inlined_call_operand.vmem [shape: f32[1,32], index: 3, kind: input, shape index: {}]   ;;  %s455_s4 = inlined_call_operand.hbm [shape: f32[2,16,32], index: 4, kind: output, shape index: {}]  }
   0x1   :  { %10 = vsyncpa [#allocation8], 0 }
   0x2   :  { %11 = vsyncpa [#allocation6], 0  ;;  %s29_s17 = sshll.u32 %s452_s1, 4  ;;  %s376_s18 = smov [#allocation7]   ;;  %s30_s17 = int_to_ptr.hbm [resolvable:$true] %s29_s17 }
   0x3   :  { %s31_s19 = sshll.u32 %s376_s18, 4  ;;  %s16_s22 = sshll.u32 %s451_s0, 4  ;;  %s32_s19 = int_to_ptr.vmem [resolvable:$true] %s31_s19  ;;  %s17_s22 = int_to_ptr.hbm [resolvable:$true] %s16_s22 }
   0x4   :  { %s377_s23 = smov 128   ;;  %s378_s24 = smov 8  }
   0x5   :  { %37 = dma.hbm_to_vmem [thread:$0]  %s30_s17, 512, %s32_s19, [#allocation8], %s377_s23, %s377_s23, %s378_s24  }
   0x6   :  { %s379_s25 = smov [#allocation4]   ;;  %s42_s1 = sshll.u32 %s453_s2, 4  ;;  %s43_s1 = int_to_ptr.hbm [resolvable:$true] %s42_s1 }
   0x7   :  { %s18_s26 = sshll.u32 %s379_s25, 4  ;;  %s380_s0 = smov [#allocation9]   ;;  %s19_s26 = int_to_ptr.vmem [resolvable:$true] %s18_s26 }
   0x8   :  { %24 = dma.hbm_to_vmem [thread:$0]  %s17_s22, 512, %s19_s26, [#allocation5], %s377_s23, %s377_s23, %s378_s24  }
   0x9   :  { %s44_s29 = sshll.u32 %s380_s0, 4  ;;  %s45_s29 = int_to_ptr.vmem [resolvable:$true] %s44_s29 }
   0xa   :  { %50 = dma.hbm_to_vmem [thread:$0]  %s43_s1, 512, %s45_s29, [#allocation8], %s377_s23, %s377_s23, %s378_s24  }
   0xb   :  { %370 = dma.done.wait [#allocation5], 512  }
   0xc   :  { %371 = vsyncadd [#allocation5], 4294966784 }
   0xd   :  { %372 = dma.done.wait [#allocation8], 1024  }
   0xe   :  { %373 = vsyncadd [#allocation8], 4294966272  ;;  %v72_v0 = vld [vmem:[#allocation9 + $0x18] sm:$0xff]  ;;  %v71_v1 = vld [vmem:[#allocation9 + $0x10] sm:$0xff]  ;;  %vm73_vm0 = vcmask 261120   ;;  %s381_s2 = smov 96  }
   0xf   :  { %98 = vmatpush.msra.mxu0 %v72_v0  ;;  %262 = vmatpush.msra.mxu3 %v72_v0  ;;  %v70_v2 = vld [vmem:[#allocation9 + $0x8] sm:$0xff]  ;;  %v69_v3 = vld [vmem:[#allocation9] sm:$0xff]  ;;  %v67_v5 = vld [vmem:[#allocation4 + $0x10] sm:$0xff]  ;;  %vm149_vm1 = vcmask 130048   ;;  %s240_s9 = sshll.u32 %s455_s4, 4  ;;  %s241_s9 = int_to_ptr.hbm [resolvable:$true] %s240_s9 }
  0x10   :  { %v65_v4 = vld [vmem:[#allocation4] sm:$0xff]  ;;  %v66_v6 = vld [vmem:[#allocation4 + $0x8] sm:$0xff]  ;;  %v68_v7 = vld [vmem:[#allocation4 + $0x18] sm:$0xff] }
  0x11   :  { %99 = vmatpush.msra.mxu0 %v71_v1  ;;  %263 = vmatpush.msra.mxu3 %v71_v1  ;;  %v147_v18 = vld [vmem:[#allocation7] sm:$0xff]  ;;  %v194_v20 = vld [vmem:[#allocation7 + $0x10] sm:$0xff]  ;;  %v148_v22 = vld [vmem:[#allocation7 + $0x8] sm:$0xff] }
  0x12   :  { %v195_v23 = vld [vmem:[#allocation7 + $0x18] sm:$0xff]  ;;  %v273_v24 = vld [vmem:[%s454_s3] ss:$0 sm:$0xff]  ;;  %s382_s3 = smov [#allocation10]  }
  0x13   :  { %100 = vmatpush.msra.mxu0 %v70_v2  ;;  %264 = vmatpush.msra.mxu3 %v70_v2  ;;  %s238_s6 = sshll.u32 %s382_s3, 4  ;;  %s239_s6 = int_to_ptr.vmem [resolvable:$true] %s238_s6 }
  0x15   :  { %101 = vmatpush.msra.mxu0 %v69_v3  ;;  %265 = vmatpush.msra.mxu3 %v69_v3 }
  0x16   :  { %254 = vmatmul.msk.f32.vlgmr.msra.gmra.mxu0 %vm73_vm0, %v65_v4  ;;  %256 = vmatmul.msk.f32.vlgmr.msra.gmra.mxu3 %vm73_vm0, %v67_v5 }
  0x1e   :  { %255 = vmatmul.msk.f32.gmra.mxu0 %vm73_vm0, %v66_v6  ;;  %257 = vmatmul.msk.f32.gmra.mxu3 %vm73_vm0, %v68_v7 }
  0x93   :  { %v103_v8 = vpop.f32.mrf.mxu0 }
  0x94   :  { %115 = vst.msk [vmem:[#allocation2] sm:$0xff] %vm73_vm0, %v103_v8 }
  0x99   :  { %v109_v9 = vpop.f32.mrf.mxu3 }
  0x9a   :  { %117 = vst.msk [vmem:[#allocation2 + $0x10] sm:$0xff] %vm73_vm0, %v109_v9 }
  0x9b   :  { %v106_v10 = vpop.f32.mrf.mxu0  ;;  %v143_v25 = vld [vmem:[#allocation2] sm:$0xff] }
  0x9c   :  { %116 = vst.msk [vmem:[#allocation2 + $0x8] sm:$0xff] %vm73_vm0, %v106_v10  ;;  %125 = vrot.lane.b32.xlu1 %v106_v10, %s381_s2 }
  0xa1   :  { %v112_v11 = vpop.f32.mrf.mxu3  ;;  %v188_v34 = vld [vmem:[#allocation2 + $0x10] sm:$0xff] }
  0xa2   :  { %118 = vst.msk [vmem:[#allocation2 + $0x18] sm:$0xff] %vm73_vm0, %v112_v11  ;;  %129 = vrot.lane.b32.xlu0 %v112_v11, %s381_s2 }
  0xa3   :  { %v144_v30 = vld [vmem:[#allocation2 + $0x8] sm:$0xff] }
  0xa4   :  { %123 = vrot.lane.b32.xlu1 %v103_v8, %s381_s2 }
  0xa9   :  { %v189_v40 = vld [vmem:[#allocation2 + $0x18] sm:$0xff] }
  0xaa   :  { %127 = vrot.lane.b32.xlu0 %v109_v9, %s381_s2 }
 0x10e   :  { %v126_v12 = vpop.permute.xlu1 %125 }
 0x10f   :  { %136 = vst.msk [vmem:[#allocation3 + $0x8] sm:$0xff] %vm73_vm0, %v126_v12 }
 0x114   :  { %v130_v13 = vpop.permute.xlu0 %129 }
 0x115   :  { %138 = vst.msk [vmem:[#allocation3 + $0x18] sm:$0xff] %vm73_vm0, %v130_v13 }
 0x116   :  { %v124_v14 = vpop.permute.xlu1 %123  ;;  %v146_v15 = vld [vmem:[#allocation3 + $0x8] sm:$0xff] }
 0x117   :  { %135 = vst.msk [vmem:[#allocation3] sm:$0xff] %vm73_vm0, %v124_v14  ;;  %170 = vmatpush.msra.mxu1 %v146_v15 }
 0x11c   :  { %v128_v16 = vpop.permute.xlu0 %127  ;;  %v192_v17 = vld [vmem:[#allocation3 + $0x18] sm:$0xff] }
 0x11d   :  { %137 = vst.msk [vmem:[#allocation3 + $0x10] sm:$0xff] %vm73_vm0, %v128_v16  ;;  %216 = vmatpush.msra.mxu2 %v192_v17 }
 0x11e   :  { %v145_v19 = vld [vmem:[#allocation3] sm:$0xff] }
 0x11f   :  { %171 = vmatpush.msra.mxu1 %v145_v19 }
 0x120   :  { %258 = vmatmul.msk.f32.vlgmr.msra.gmra.mxu1 %vm149_vm1, %v147_v18 }
 0x124   :  { %v191_v21 = vld [vmem:[#allocation3 + $0x10] sm:$0xff] }
 0x125   :  { %217 = vmatpush.msra.mxu2 %v191_v21 }
 0x126   :  { %260 = vmatmul.msk.f32.vlgmr.msra.gmra.mxu2 %vm149_vm1, %v194_v20 }
 0x128   :  { %259 = vmatmul.msk.f32.gmra.mxu1 %vm149_vm1, %v148_v22 }
 0x12e   :  { %261 = vmatmul.msk.f32.gmra.mxu2 %vm149_vm1, %v195_v23 }
 0x19d   :  { %v173_v26 = vpop.f32.mrf.mxu1 }
 0x19e   :  { %v179_v27 = vadd.f32 %v173_v26, %v143_v25 }
 0x1a0   :  { %v181_v28 = vadd.f32 %v273_v24, %v179_v27 }
 0x1a2   :  { %v183_v29 = vmax.f32 %v181_v28, 0.0 }
 0x1a4   :  { %185 = vst.msk [vmem:[#allocation10] sm:$0xff] %vm73_vm0, %v183_v29 }
 0x1a5   :  { %v176_v31 = vpop.f32.mrf.mxu1 }
 0x1a6   :  { %v180_v32 = vadd.f32 %v176_v31, %v144_v30 }
 0x1a8   :  { %v182_v33 = vadd.f32 %v273_v24, %v180_v32 }
 0x1a9   :  { %v219_v35 = vpop.f32.mrf.mxu2 }
 0x1aa   :  { %v184_v36 = vmax.f32 %v182_v33, 0.0  ;;  %v225_v37 = vadd.f32 %v219_v35, %v188_v34 }
 0x1ac   :  { %186 = vst.msk [vmem:[#allocation10 + $0x8] sm:$0xff] %vm73_vm0, %v184_v36  ;;  %v227_v38 = vadd.f32 %v273_v24, %v225_v37 }
 0x1ae   :  { %v229_v39 = vmax.f32 %v227_v38, 0.0 }
 0x1b0   :  { %232 = vst.msk [vmem:[#allocation10 + $0x10] sm:$0xff] %vm73_vm0, %v229_v39 }
 0x1b1   :  { %v222_v41 = vpop.f32.mrf.mxu2 }
 0x1b2   :  { %v226_v42 = vadd.f32 %v222_v41, %v189_v40 }
 0x1b4   :  { %v228_v43 = vadd.f32 %v273_v24, %v226_v42 }
 0x1b6   :  { %v230_v44 = vmax.f32 %v228_v43, 0.0 }
 0x1b8   :  { %233 = vst.msk [vmem:[#allocation10 + $0x18] sm:$0xff] %vm73_vm0, %v230_v44 }
 0x1b9   :  { %246 = dma.vmem_to_hbm [thread:$0]  %s239_s6, 512, %s241_s9, [#allocation6], %s377_s23, %s377_s23, %s378_s24  }
 0x1ba   :  { %374 = dma.done.wait [#allocation6], 512  }
 0x1bb   :  { %375 = vsyncadd [#allocation6], 4294966784 }
 0x1bc   :  { %251 = vsyncpa [#allocation5], 1 }
 0x1bd   :  { %252 = vsyncpa [#allocation8], 1 }
 0x1be   :  { %253 = vsyncpa [#allocation6], 1 }

</bundles_post_ra>
